<compile_context>
chip_gen: v6e
topology: v6e:2x2x1
jax: 0.10.0
libtpu: 0.0.40
codegen_flags: <defaults>
</compile_context>

<pallas_src>
import functools

import jax
import jax.numpy as jnp
import numpy as np
from jax.experimental import pallas as pl
from jax.experimental.pallas import tpu as pltpu


def _lstm_kernel(lens_ref, x_ref, wih_ref, whh_ref, b_ref, *rest,
                 T, NB, D, H, apply_dropout):
    if apply_dropout:
        drop_ref, o_ref = rest
    else:
        (o_ref,) = rest

    # ---- input projection for every timestep in ONE MXU matmul ----
    # x block is (T, NB, D) time-major; collapse leading dims (NB is a
    # multiple of 8, so this is a layout no-op).
    x2d = x_ref[...].reshape(T * NB, D)
    gx = jnp.dot(x2d, wih_ref[...],
                 preferred_element_type=jnp.float32) + b_ref[...]   # (T*NB, 4H)

    whh = whh_ref[...]                       # (H, 4H), resident in vregs
    lens = lens_ref[...]                     # (NB, 1) int32

    h = jnp.zeros((NB, H), jnp.float32)
    c = jnp.zeros((NB, H), jnp.float32)

    def sigmoid(v):
        return 1.0 / (1.0 + jnp.exp(-v))

    # ---- sequential recurrence; T is small & static -> unrolled ----
    # TODO(synk): for long sequences switch to pl.loop / a time-grid axis.
    for t in range(T):
        g = gx[t * NB:(t + 1) * NB, :] + jnp.dot(
            h, whh, preferred_element_type=jnp.float32)             # (NB, 4H)
        # PyTorch gate order: i, f, g, o
        i_g = sigmoid(g[:, 0 * H:1 * H])
        f_g = sigmoid(g[:, 1 * H:2 * H])
        g_g = jnp.tanh(g[:, 2 * H:3 * H])
        o_g = sigmoid(g[:, 3 * H:4 * H])
        c = f_g * c + i_g * g_g
        h = o_g * jnp.tanh(c)

        out = h
        if apply_dropout:
            out = out * drop_ref[t]          # pre-scaled keep-mask (NB, H)

        # packed-sequence semantics: zero outputs past each sample's length
        valid = t < lens                     # (NB, 1) bool, broadcasts over H
        o_ref[t] = jnp.where(valid, out, 0.0).astype(o_ref.dtype)


def lstm_dropout(x, seq_lengths, params, *, dropout=0.0, deterministic=True,
                 rng_key=None):
    """LSTMDropout.forward.

    x:            (N, T, D) padded, batch-first (dense form of the packed input)
    seq_lengths:  (N,) int
    params:       weight_ih (4H, D), weight_hh (4H, H), bias_ih (4H,), bias_hh (4H,)

    Returns (padded_out, seq_lengths): padded_out is (N, T, H) with zeros at
    t >= seq_lengths[n] — the dense equivalent of the returned PackedSequence.
    """
    N, T, D = x.shape
    H4 = params["weight_ih"].shape[0]
    H = H4 // 4

    NB = 8                                   # sublane-aligned batch tile
    Np = ((N + NB - 1) // NB) * NB

    # time-major layout, batch padded to a sublane multiple
    x_tm = jnp.transpose(x, (1, 0, 2)).astype(jnp.float32)           # (T, N, D)
    x_tm = jnp.pad(x_tm, ((0, 0), (0, Np - N), (0, 0)))
    lens = jnp.pad(jnp.asarray(seq_lengths, jnp.int32),
                   (0, Np - N)).reshape(Np, 1)

    w_ih_t = jnp.transpose(params["weight_ih"]).astype(jnp.float32)  # (D, 4H)
    w_hh_t = jnp.transpose(params["weight_hh"]).astype(jnp.float32)  # (H, 4H)
    b = (params["bias_ih"] + params["bias_hh"]).reshape(1, H4).astype(jnp.float32)

    apply_dropout = (dropout > 0.0) and (not deterministic)

    args = [lens, x_tm, w_ih_t, w_hh_t, b]
    in_specs = [
        pl.BlockSpec((NB, 1), lambda bi: (bi, 0)),        # seq lengths
        pl.BlockSpec((T, NB, D), lambda bi: (0, bi, 0)),  # x (time-major)
        pl.BlockSpec((D, H4), lambda bi: (0, 0)),         # W_ih^T
        pl.BlockSpec((H, H4), lambda bi: (0, 0)),         # W_hh^T
        pl.BlockSpec((1, H4), lambda bi: (0, 0)),         # folded bias
    ]
    if apply_dropout:
        if rng_key is None:
            rng_key = jax.random.PRNGKey(0)
        keep = jax.random.uniform(rng_key, (T, Np, H)) >= dropout
        drop_mask = keep.astype(jnp.float32) / (1.0 - dropout)
        args.append(drop_mask)
        in_specs.append(pl.BlockSpec((T, NB, H), lambda bi: (0, bi, 0)))

    kernel = functools.partial(_lstm_kernel, T=T, NB=NB, D=D, H=H,
                               apply_dropout=apply_dropout)

    out_tm = pl.pallas_call(
        kernel,
        out_shape=jax.ShapeDtypeStruct((T, Np, H), jnp.float32),
        grid_spec=pltpu.PrefetchScalarGridSpec(
            num_scalar_prefetch=0,
            grid=(Np // NB,),                # independent batch tiles
            in_specs=in_specs,
            out_specs=pl.BlockSpec((T, NB, H), lambda bi: (0, bi, 0)),
            scratch_shapes=[],               # h/c/gates stay in vregs
        ),
        compiler_params=pltpu.CompilerParams(
            dimension_semantics=("parallel",)),
    )(*args)

    out = jnp.transpose(out_tm, (1, 0, 2))[:N]             # (N, T, H)
    return out, jnp.asarray(seq_lengths, jnp.int32)


def lstm_dropout_ref(x, seq_lengths, params):
    """Pure-JAX eval-mode reference (matches PyTorch LSTM + packed masking)."""
    N, T, D = x.shape
    H = params["weight_hh"].shape[1]
    w_ih_t = params["weight_ih"].T
    w_hh_t = params["weight_hh"].T
    b = params["bias_ih"] + params["bias_hh"]
    hp = jax.lax.Precision.HIGHEST

    def step(carry, x_t):
        h, c = carry
        g = (jnp.dot(x_t, w_ih_t, precision=hp)
             + jnp.dot(h, w_hh_t, precision=hp) + b)
        i, f, gg, o = jnp.split(g, 4, axis=-1)
        i = jax.nn.sigmoid(i)
        f = jax.nn.sigmoid(f)
        gg = jnp.tanh(gg)
        o = jax.nn.sigmoid(o)
        c = f * c + i * gg
        h = o * jnp.tanh(c)
        return (h, c), h

    h0 = jnp.zeros((N, H), jnp.float32)
    c0 = jnp.zeros((N, H), jnp.float32)
    _, hs = jax.lax.scan(step, (h0, c0), jnp.transpose(x, (1, 0, 2)))
    out = jnp.transpose(hs, (1, 0, 2))                      # (N, T, H)
    mask = (jnp.arange(T)[None, :] < seq_lengths[:, None])[:, :, None]
    return jnp.where(mask, out, 0.0)


if __name__ == "__main__":
    # batch=2, seq=8, input_size=16, hidden=32 (so 4H = 128 lanes)
    N, T, D, H = 2, 8, 16, 32

    key = jax.random.PRNGKey(0)
    kx, kw1, kw2, kb1, kb2, kd = jax.random.split(key, 6)
    x = jax.random.normal(kx, (N, T, D), jnp.float32)
    seq_lengths = jnp.array([T, 5], jnp.int32)

    s = 1.0 / float(np.sqrt(H))
    params = {
        "weight_ih": jax.random.uniform(kw1, (4 * H, D), jnp.float32, -s, s),
        "weight_hh": jax.random.uniform(kw2, (4 * H, H), jnp.float32, -s, s),
        "bias_ih":   jax.random.uniform(kb1, (4 * H,), jnp.float32, -s, s),
        "bias_hh":   jax.random.uniform(kb2, (4 * H,), jnp.float32, -s, s),
    }

    # Eval mode (nn.Dropout is the identity): check against pure-JAX LSTM.
    out, lens = lstm_dropout(x, seq_lengths, params,
                             dropout=0.2, deterministic=True)
    out = jax.block_until_ready(out)
    ref = lstm_dropout_ref(x, seq_lengths, params)
    np.testing.assert_allclose(np.asarray(out), np.asarray(ref),
                               rtol=2e-3, atol=2e-3)

    # Training mode: exercise the dropout path (jax.random mask, not torch RNG).
    out_tr, _ = lstm_dropout(x, seq_lengths, params,
                             dropout=0.2, deterministic=False, rng_key=kd)
    out_tr = np.asarray(jax.block_until_ready(out_tr))
    assert out_tr.shape == (N, T, H)
    assert np.all(out_tr[1, 5:] == 0.0)       # padded timesteps stay zero

    print("KERNEL_OK")
</pallas_src>

<mosaic_0001>
module attributes {stable_mosaic.version = 11 : i64} {
  func.func @_lstm_kernel(%arg0: i32, %arg1: memref<8x1xi32, #tpu.memory_space<vmem>>, %arg2: memref<8x8x16xf32, #tpu.memory_space<vmem>>, %arg3: memref<16x128xf32, #tpu.memory_space<vmem>>, %arg4: memref<32x128xf32, #tpu.memory_space<vmem>>, %arg5: memref<1x128xf32, #tpu.memory_space<vmem>>, %arg6: memref<8x8x32xf32, #tpu.memory_space<vmem>>) attributes {dimension_semantics = [#tpu.dimension_semantics<parallel>], iteration_bounds = array<i64: 1>, scalar_prefetch = 0 : i64, scratch_operands = 0 : i64, tpu.core_type = #tpu.core_type<tc>, window_params = [{transform_indices = @transform_0, window_bounds = array<i64: 8, 1>}, {transform_indices = @transform_1, window_bounds = array<i64: 8, 8, 16>}, {pipeline_mode = #tpu.pipeline_mode<synchronous>, transform_indices = @transform_2, window_bounds = array<i64: 16, 128>}, {pipeline_mode = #tpu.pipeline_mode<synchronous>, transform_indices = @transform_3, window_bounds = array<i64: 32, 128>}, {pipeline_mode = #tpu.pipeline_mode<synchronous>, transform_indices = @transform_4, window_bounds = array<i64: 1, 128>}, {transform_indices = @transform_5, window_bounds = array<i64: 8, 8, 32>}]} {
    %c0 = arith.constant 0 : index
    %c0_0 = arith.constant 0 : index
    %c0_1 = arith.constant 0 : index
    %0 = vector.load %arg2[%c0, %c0_0, %c0_1] : memref<8x8x16xf32, #tpu.memory_space<vmem>>, vector<8x8x16xf32>
    %1 = vector.shape_cast %0 : vector<8x8x16xf32> to vector<64x16xf32>
    %c0_2 = arith.constant 0 : index
    %c0_3 = arith.constant 0 : index
    %2 = vector.load %arg3[%c0_2, %c0_3] : memref<16x128xf32, #tpu.memory_space<vmem>>, vector<16x128xf32>
    %cst = arith.constant dense<0.000000e+00> : vector<64x128xf32>
    %3 = tpu.matmul %1, %2, %cst {dimension_numbers = #tpu.dot_dimension_numbers<[1], [0], [0], [1], [0, 0, 1, 1], [], []>} : vector<64x16xf32>, vector<16x128xf32>, vector<64x128xf32> -> vector<64x128xf32>
    %c0_4 = arith.constant 0 : index
    %c0_5 = arith.constant 0 : index
    %4 = vector.load %arg5[%c0_4, %c0_5] : memref<1x128xf32, #tpu.memory_space<vmem>>, vector<1x128xf32>
    %5 = vector.broadcast %4 : vector<1x128xf32> to vector<64x128xf32>
    %6 = arith.addf %3, %5 : vector<64x128xf32>
    %c0_6 = arith.constant 0 : index
    %c0_7 = arith.constant 0 : index
    %7 = vector.load %arg4[%c0_6, %c0_7] : memref<32x128xf32, #tpu.memory_space<vmem>>, vector<32x128xf32>
    %c0_8 = arith.constant 0 : index
    %c0_9 = arith.constant 0 : index
    %8 = vector.load %arg1[%c0_8, %c0_9] : memref<8x1xi32, #tpu.memory_space<vmem>>, vector<8x1xi32>
    %cst_10 = arith.constant 0.000000e+00 : f32
    %9 = vector.broadcast %cst_10 : f32 to vector<8x32xf32>
    %cst_11 = arith.constant 0.000000e+00 : f32
    %10 = vector.broadcast %cst_11 : f32 to vector<8x32xf32>
    %11 = vector.extract_strided_slice %6 {offsets = [0, 0], sizes = [8, 128], strides = [1, 1]} : vector<64x128xf32> to vector<8x128xf32>
    %cst_12 = arith.constant dense<0.000000e+00> : vector<8x128xf32>
    %12 = tpu.matmul %9, %7, %cst_12 {dimension_numbers = #tpu.dot_dimension_numbers<[1], [0], [0], [1], [0, 0, 1, 1], [], []>} : vector<8x32xf32>, vector<32x128xf32>, vector<8x128xf32> -> vector<8x128xf32>
    %13 = arith.addf %11, %12 : vector<8x128xf32>
    %14 = vector.extract_strided_slice %13 {offsets = [0, 0], sizes = [8, 32], strides = [1, 1]} : vector<8x128xf32> to vector<8x32xf32>
    %cst_13 = arith.constant 0.000000e+00 : f32
    %15 = vector.broadcast %cst_13 : f32 to vector<8x32xf32>
    %16 = arith.subf %15, %14 : vector<8x32xf32>
    %17 = math.exp %16 : vector<8x32xf32>
    %cst_14 = arith.constant 1.000000e+00 : f32
    %18 = vector.broadcast %cst_14 : f32 to vector<8x32xf32>
    %19 = arith.addf %18, %17 : vector<8x32xf32>
    %cst_15 = arith.constant 1.000000e+00 : f32
    %20 = vector.broadcast %cst_15 : f32 to vector<8x32xf32>
    %21 = arith.divf %20, %19 : vector<8x32xf32>
    %22 = vector.extract_strided_slice %13 {offsets = [0, 32], sizes = [8, 32], strides = [1, 1]} : vector<8x128xf32> to vector<8x32xf32>
    %cst_16 = arith.constant 0.000000e+00 : f32
    %23 = vector.broadcast %cst_16 : f32 to vector<8x32xf32>
    %24 = arith.subf %23, %22 : vector<8x32xf32>
    %25 = math.exp %24 : vector<8x32xf32>
    %cst_17 = arith.constant 1.000000e+00 : f32
    %26 = vector.broadcast %cst_17 : f32 to vector<8x32xf32>
    %27 = arith.addf %26, %25 : vector<8x32xf32>
    %cst_18 = arith.constant 1.000000e+00 : f32
    %28 = vector.broadcast %cst_18 : f32 to vector<8x32xf32>
    %29 = arith.divf %28, %27 : vector<8x32xf32>
    %30 = vector.extract_strided_slice %13 {offsets = [0, 64], sizes = [8, 32], strides = [1, 1]} : vector<8x128xf32> to vector<8x32xf32>
    %31 = math.tanh %30 : vector<8x32xf32>
    %32 = vector.extract_strided_slice %13 {offsets = [0, 96], sizes = [8, 32], strides = [1, 1]} : vector<8x128xf32> to vector<8x32xf32>
    %cst_19 = arith.constant 0.000000e+00 : f32
    %33 = vector.broadcast %cst_19 : f32 to vector<8x32xf32>
    %34 = arith.subf %33, %32 : vector<8x32xf32>
    %35 = math.exp %34 : vector<8x32xf32>
    %cst_20 = arith.constant 1.000000e+00 : f32
    %36 = vector.broadcast %cst_20 : f32 to vector<8x32xf32>
    %37 = arith.addf %36, %35 : vector<8x32xf32>
    %cst_21 = arith.constant 1.000000e+00 : f32
    %38 = vector.broadcast %cst_21 : f32 to vector<8x32xf32>
    %39 = arith.divf %38, %37 : vector<8x32xf32>
    %40 = arith.mulf %29, %10 : vector<8x32xf32>
    %41 = arith.mulf %21, %31 : vector<8x32xf32>
    %42 = arith.addf %40, %41 : vector<8x32xf32>
    %43 = math.tanh %42 : vector<8x32xf32>
    %44 = arith.mulf %39, %43 : vector<8x32xf32>
    %c0_i32 = arith.constant 0 : i32
    %45 = vector.broadcast %c0_i32 : i32 to vector<8x1xi32>
    %46 = arith.cmpi sgt, %8, %45 : vector<8x1xi32>
    %cst_22 = arith.constant 0.000000e+00 : f32
    %47 = vector.shape_cast %46 : vector<8x1xi1> to vector<8x1xi1>
    %48 = vector.broadcast %47 : vector<8x1xi1> to vector<8x32xi1>
    %49 = vector.broadcast %cst_22 : f32 to vector<8x32xf32>
    %50 = arith.select %48, %44, %49 : vector<8x32xi1>, vector<8x32xf32>
    %c0_23 = arith.constant 0 : index
    %c0_24 = arith.constant 0 : index
    %c0_25 = arith.constant 0 : index
    %51 = vector.load %arg6[%c0_23, %c0_24, %c0_25] : memref<8x8x32xf32, #tpu.memory_space<vmem>>, vector<1x8x32xf32>
    %52 = vector.shape_cast %51 : vector<1x8x32xf32> to vector<8x32xf32>
    %53 = vector.shape_cast %50 : vector<8x32xf32> to vector<1x8x32xf32>
    tpu.vector_store %arg6[%c0_23, %c0_24, %c0_25], %53 {strides = array<i32>} : memref<8x8x32xf32, #tpu.memory_space<vmem>>, vector<1x8x32xf32>,
    %54 = vector.extract_strided_slice %6 {offsets = [8, 0], sizes = [8, 128], strides = [1, 1]} : vector<64x128xf32> to vector<8x128xf32>
    %cst_26 = arith.constant dense<0.000000e+00> : vector<8x128xf32>
    %55 = tpu.matmul %44, %7, %cst_26 {dimension_numbers = #tpu.dot_dimension_numbers<[1], [0], [0], [1], [0, 0, 1, 1], [], []>} : vector<8x32xf32>, vector<32x128xf32>, vector<8x128xf32> -> vector<8x128xf32>
    %56 = arith.addf %54, %55 : vector<8x128xf32>
    %57 = vector.extract_strided_slice %56 {offsets = [0, 0], sizes = [8, 32], strides = [1, 1]} : vector<8x128xf32> to vector<8x32xf32>
    %cst_27 = arith.constant 0.000000e+00 : f32
    %58 = vector.broadcast %cst_27 : f32 to vector<8x32xf32>
    %59 = arith.subf %58, %57 : vector<8x32xf32>
    %60 = math.exp %59 : vector<8x32xf32>
    %cst_28 = arith.constant 1.000000e+00 : f32
    %61 = vector.broadcast %cst_28 : f32 to vector<8x32xf32>
    %62 = arith.addf %61, %60 : vector<8x32xf32>
    %cst_29 = arith.constant 1.000000e+00 : f32
    %63 = vector.broadcast %cst_29 : f32 to vector<8x32xf32>
    %64 = arith.divf %63, %62 : vector<8x32xf32>
    %65 = vector.extract_strided_slice %56 {offsets = [0, 32], sizes = [8, 32], strides = [1, 1]} : vector<8x128xf32> to vector<8x32xf32>
    %cst_30 = arith.constant 0.000000e+00 : f32
    %66 = vector.broadcast %cst_30 : f32 to vector<8x32xf32>
    %67 = arith.subf %66, %65 : vector<8x32xf32>
    %68 = math.exp %67 : vector<8x32xf32>
    %cst_31 = arith.constant 1.000000e+00 : f32
    %69 = vector.broadcast %cst_31 : f32 to vector<8x32xf32>
    %70 = arith.addf %69, %68 : vector<8x32xf32>
    %cst_32 = arith.constant 1.000000e+00 : f32
    %71 = vector.broadcast %cst_32 : f32 to vector<8x32xf32>
    %72 = arith.divf %71, %70 : vector<8x32xf32>
    %73 = vector.extract_strided_slice %56 {offsets = [0, 64], sizes = [8, 32], strides = [1, 1]} : vector<8x128xf32> to vector<8x32xf32>
    %74 = math.tanh %73 : vector<8x32xf32>
    %75 = vector.extract_strided_slice %56 {offsets = [0, 96], sizes = [8, 32], strides = [1, 1]} : vector<8x128xf32> to vector<8x32xf32>
    %cst_33 = arith.constant 0.000000e+00 : f32
    %76 = vector.broadcast %cst_33 : f32 to vector<8x32xf32>
    %77 = arith.subf %76, %75 : vector<8x32xf32>
    %78 = math.exp %77 : vector<8x32xf32>
    %cst_34 = arith.constant 1.000000e+00 : f32
    %79 = vector.broadcast %cst_34 : f32 to vector<8x32xf32>
    %80 = arith.addf %79, %78 : vector<8x32xf32>
    %cst_35 = arith.constant 1.000000e+00 : f32
    %81 = vector.broadcast %cst_35 : f32 to vector<8x32xf32>
    %82 = arith.divf %81, %80 : vector<8x32xf32>
    %83 = arith.mulf %72, %42 : vector<8x32xf32>
    %84 = arith.mulf %64, %74 : vector<8x32xf32>
    %85 = arith.addf %83, %84 : vector<8x32xf32>
    %86 = math.tanh %85 : vector<8x32xf32>
    %87 = arith.mulf %82, %86 : vector<8x32xf32>
    %c1_i32 = arith.constant 1 : i32
    %88 = vector.broadcast %c1_i32 : i32 to vector<8x1xi32>
    %89 = arith.cmpi sgt, %8, %88 : vector<8x1xi32>
    %cst_36 = arith.constant 0.000000e+00 : f32
    %90 = vector.shape_cast %89 : vector<8x1xi1> to vector<8x1xi1>
    %91 = vector.broadcast %90 : vector<8x1xi1> to vector<8x32xi1>
    %92 = vector.broadcast %cst_36 : f32 to vector<8x32xf32>
    %93 = arith.select %91, %87, %92 : vector<8x32xi1>, vector<8x32xf32>
    %c1 = arith.constant 1 : index
    %c0_37 = arith.constant 0 : index
    %c0_38 = arith.constant 0 : index
    %94 = vector.load %arg6[%c1, %c0_37, %c0_38] : memref<8x8x32xf32, #tpu.memory_space<vmem>>, vector<1x8x32xf32>
    %95 = vector.shape_cast %94 : vector<1x8x32xf32> to vector<8x32xf32>
    %96 = vector.shape_cast %93 : vector<8x32xf32> to vector<1x8x32xf32>
    tpu.vector_store %arg6[%c1, %c0_37, %c0_38], %96 {strides = array<i32>} : memref<8x8x32xf32, #tpu.memory_space<vmem>>, vector<1x8x32xf32>,
    %97 = vector.extract_strided_slice %6 {offsets = [16, 0], sizes = [8, 128], strides = [1, 1]} : vector<64x128xf32> to vector<8x128xf32>
    %cst_39 = arith.constant dense<0.000000e+00> : vector<8x128xf32>
    %98 = tpu.matmul %87, %7, %cst_39 {dimension_numbers = #tpu.dot_dimension_numbers<[1], [0], [0], [1], [0, 0, 1, 1], [], []>} : vector<8x32xf32>, vector<32x128xf32>, vector<8x128xf32> -> vector<8x128xf32>
    %99 = arith.addf %97, %98 : vector<8x128xf32>
    %100 = vector.extract_strided_slice %99 {offsets = [0, 0], sizes = [8, 32], strides = [1, 1]} : vector<8x128xf32> to vector<8x32xf32>
    %cst_40 = arith.constant 0.000000e+00 : f32
    %101 = vector.broadcast %cst_40 : f32 to vector<8x32xf32>
    %102 = arith.subf %101, %100 : vector<8x32xf32>
    %103 = math.exp %102 : vector<8x32xf32>
    %cst_41 = arith.constant 1.000000e+00 : f32
    %104 = vector.broadcast %cst_41 : f32 to vector<8x32xf32>
    %105 = arith.addf %104, %103 : vector<8x32xf32>
    %cst_42 = arith.constant 1.000000e+00 : f32
    %106 = vector.broadcast %cst_42 : f32 to vector<8x32xf32>
    %107 = arith.divf %106, %105 : vector<8x32xf32>
    %108 = vector.extract_strided_slice %99 {offsets = [0, 32], sizes = [8, 32], strides = [1, 1]} : vector<8x128xf32> to vector<8x32xf32>
    %cst_43 = arith.constant 0.000000e+00 : f32
    %109 = vector.broadcast %cst_43 : f32 to vector<8x32xf32>
    %110 = arith.subf %109, %108 : vector<8x32xf32>
    %111 = math.exp %110 : vector<8x32xf32>
    %cst_44 = arith.constant 1.000000e+00 : f32
    %112 = vector.broadcast %cst_44 : f32 to vector<8x32xf32>
    %113 = arith.addf %112, %111 : vector<8x32xf32>
    %cst_45 = arith.constant 1.000000e+00 : f32
    %114 = vector.broadcast %cst_45 : f32 to vector<8x32xf32>
    %115 = arith.divf %114, %113 : vector<8x32xf32>
    %116 = vector.extract_strided_slice %99 {offsets = [0, 64], sizes = [8, 32], strides = [1, 1]} : vector<8x128xf32> to vector<8x32xf32>
    %117 = math.tanh %116 : vector<8x32xf32>
    %118 = vector.extract_strided_slice %99 {offsets = [0, 96], sizes = [8, 32], strides = [1, 1]} : vector<8x128xf32> to vector<8x32xf32>
    %cst_46 = arith.constant 0.000000e+00 : f32
    %119 = vector.broadcast %cst_46 : f32 to vector<8x32xf32>
    %120 = arith.subf %119, %118 : vector<8x32xf32>
    %121 = math.exp %120 : vector<8x32xf32>
    %cst_47 = arith.constant 1.000000e+00 : f32
    %122 = vector.broadcast %cst_47 : f32 to vector<8x32xf32>
    %123 = arith.addf %122, %121 : vector<8x32xf32>
    %cst_48 = arith.constant 1.000000e+00 : f32
    %124 = vector.broadcast %cst_48 : f32 to vector<8x32xf32>
    %125 = arith.divf %124, %123 : vector<8x32xf32>
    %126 = arith.mulf %115, %85 : vector<8x32xf32>
    %127 = arith.mulf %107, %117 : vector<8x32xf32>
    %128 = arith.addf %126, %127 : vector<8x32xf32>
    %129 = math.tanh %128 : vector<8x32xf32>
    %130 = arith.mulf %125, %129 : vector<8x32xf32>
    %c2_i32 = arith.constant 2 : i32
    %131 = vector.broadcast %c2_i32 : i32 to vector<8x1xi32>
    %132 = arith.cmpi sgt, %8, %131 : vector<8x1xi32>
    %cst_49 = arith.constant 0.000000e+00 : f32
    %133 = vector.shape_cast %132 : vector<8x1xi1> to vector<8x1xi1>
    %134 = vector.broadcast %133 : vector<8x1xi1> to vector<8x32xi1>
    %135 = vector.broadcast %cst_49 : f32 to vector<8x32xf32>
    %136 = arith.select %134, %130, %135 : vector<8x32xi1>, vector<8x32xf32>
    %c2 = arith.constant 2 : index
    %c0_50 = arith.constant 0 : index
    %c0_51 = arith.constant 0 : index
    %137 = vector.load %arg6[%c2, %c0_50, %c0_51] : memref<8x8x32xf32, #tpu.memory_space<vmem>>, vector<1x8x32xf32>
    %138 = vector.shape_cast %137 : vector<1x8x32xf32> to vector<8x32xf32>
    %139 = vector.shape_cast %136 : vector<8x32xf32> to vector<1x8x32xf32>
    tpu.vector_store %arg6[%c2, %c0_50, %c0_51], %139 {strides = array<i32>} : memref<8x8x32xf32, #tpu.memory_space<vmem>>, vector<1x8x32xf32>,
    %140 = vector.extract_strided_slice %6 {offsets = [24, 0], sizes = [8, 128], strides = [1, 1]} : vector<64x128xf32> to vector<8x128xf32>
    %cst_52 = arith.constant dense<0.000000e+00> : vector<8x128xf32>
    %141 = tpu.matmul %130, %7, %cst_52 {dimension_numbers = #tpu.dot_dimension_numbers<[1], [0], [0], [1], [0, 0, 1, 1], [], []>} : vector<8x32xf32>, vector<32x128xf32>, vector<8x128xf32> -> vector<8x128xf32>
    %142 = arith.addf %140, %141 : vector<8x128xf32>
    %143 = vector.extract_strided_slice %142 {offsets = [0, 0], sizes = [8, 32], strides = [1, 1]} : vector<8x128xf32> to vector<8x32xf32>
    %cst_53 = arith.constant 0.000000e+00 : f32
    %144 = vector.broadcast %cst_53 : f32 to vector<8x32xf32>
    %145 = arith.subf %144, %143 : vector<8x32xf32>
    %146 = math.exp %145 : vector<8x32xf32>
    %cst_54 = arith.constant 1.000000e+00 : f32
    %147 = vector.broadcast %cst_54 : f32 to vector<8x32xf32>
    %148 = arith.addf %147, %146 : vector<8x32xf32>
    %cst_55 = arith.constant 1.000000e+00 : f32
    %149 = vector.broadcast %cst_55 : f32 to vector<8x32xf32>
    %150 = arith.divf %149, %148 : vector<8x32xf32>
    %151 = vector.extract_strided_slice %142 {offsets = [0, 32], sizes = [8, 32], strides = [1, 1]} : vector<8x128xf32> to vector<8x32xf32>
    %cst_56 = arith.constant 0.000000e+00 : f32
    %152 = vector.broadcast %cst_56 : f32 to vector<8x32xf32>
    %153 = arith.subf %152, %151 : vector<8x32xf32>
    %154 = math.exp %153 : vector<8x32xf32>
    %cst_57 = arith.constant 1.000000e+00 : f32
    %155 = vector.broadcast %cst_57 : f32 to vector<8x32xf32>
    %156 = arith.addf %155, %154 : vector<8x32xf32>
    %cst_58 = arith.constant 1.000000e+00 : f32
    %157 = vector.broadcast %cst_58 : f32 to vector<8x32xf32>
    %158 = arith.divf %157, %156 : vector<8x32xf32>
    %159 = vector.extract_strided_slice %142 {offsets = [0, 64], sizes = [8, 32], strides = [1, 1]} : vector<8x128xf32> to vector<8x32xf32>
    %160 = math.tanh %159 : vector<8x32xf32>
    %161 = vector.extract_strided_slice %142 {offsets = [0, 96], sizes = [8, 32], strides = [1, 1]} : vector<8x128xf32> to vector<8x32xf32>
    %cst_59 = arith.constant 0.000000e+00 : f32
    %162 = vector.broadcast %cst_59 : f32 to vector<8x32xf32>
    %163 = arith.subf %162, %161 : vector<8x32xf32>
    %164 = math.exp %163 : vector<8x32xf32>
    %cst_60 = arith.constant 1.000000e+00 : f32
    %165 = vector.broadcast %cst_60 : f32 to vector<8x32xf32>
    %166 = arith.addf %165, %164 : vector<8x32xf32>
    %cst_61 = arith.constant 1.000000e+00 : f32
    %167 = vector.broadcast %cst_61 : f32 to vector<8x32xf32>
    %168 = arith.divf %167, %166 : vector<8x32xf32>
    %169 = arith.mulf %158, %128 : vector<8x32xf32>
    %170 = arith.mulf %150, %160 : vector<8x32xf32>
    %171 = arith.addf %169, %170 : vector<8x32xf32>
    %172 = math.tanh %171 : vector<8x32xf32>
    %173 = arith.mulf %168, %172 : vector<8x32xf32>
    %c3_i32 = arith.constant 3 : i32
    %174 = vector.broadcast %c3_i32 : i32 to vector<8x1xi32>
    %175 = arith.cmpi sgt, %8, %174 : vector<8x1xi32>
    %cst_62 = arith.constant 0.000000e+00 : f32
    %176 = vector.shape_cast %175 : vector<8x1xi1> to vector<8x1xi1>
    %177 = vector.broadcast %176 : vector<8x1xi1> to vector<8x32xi1>
    %178 = vector.broadcast %cst_62 : f32 to vector<8x32xf32>
    %179 = arith.select %177, %173, %178 : vector<8x32xi1>, vector<8x32xf32>
    %c3 = arith.constant 3 : index
    %c0_63 = arith.constant 0 : index
    %c0_64 = arith.constant 0 : index
    %180 = vector.load %arg6[%c3, %c0_63, %c0_64] : memref<8x8x32xf32, #tpu.memory_space<vmem>>, vector<1x8x32xf32>
    %181 = vector.shape_cast %180 : vector<1x8x32xf32> to vector<8x32xf32>
    %182 = vector.shape_cast %179 : vector<8x32xf32> to vector<1x8x32xf32>
    tpu.vector_store %arg6[%c3, %c0_63, %c0_64], %182 {strides = array<i32>} : memref<8x8x32xf32, #tpu.memory_space<vmem>>, vector<1x8x32xf32>,
    %183 = vector.extract_strided_slice %6 {offsets = [32, 0], sizes = [8, 128], strides = [1, 1]} : vector<64x128xf32> to vector<8x128xf32>
    %cst_65 = arith.constant dense<0.000000e+00> : vector<8x128xf32>
    %184 = tpu.matmul %173, %7, %cst_65 {dimension_numbers = #tpu.dot_dimension_numbers<[1], [0], [0], [1], [0, 0, 1, 1], [], []>} : vector<8x32xf32>, vector<32x128xf32>, vector<8x128xf32> -> vector<8x128xf32>
    %185 = arith.addf %183, %184 : vector<8x128xf32>
    %186 = vector.extract_strided_slice %185 {offsets = [0, 0], sizes = [8, 32], strides = [1, 1]} : vector<8x128xf32> to vector<8x32xf32>
    %cst_66 = arith.constant 0.000000e+00 : f32
    %187 = vector.broadcast %cst_66 : f32 to vector<8x32xf32>
    %188 = arith.subf %187, %186 : vector<8x32xf32>
    %189 = math.exp %188 : vector<8x32xf32>
    %cst_67 = arith.constant 1.000000e+00 : f32
    %190 = vector.broadcast %cst_67 : f32 to vector<8x32xf32>
    %191 = arith.addf %190, %189 : vector<8x32xf32>
    %cst_68 = arith.constant 1.000000e+00 : f32
    %192 = vector.broadcast %cst_68 : f32 to vector<8x32xf32>
    %193 = arith.divf %192, %191 : vector<8x32xf32>
    %194 = vector.extract_strided_slice %185 {offsets = [0, 32], sizes = [8, 32], strides = [1, 1]} : vector<8x128xf32> to vector<8x32xf32>
    %cst_69 = arith.constant 0.000000e+00 : f32
    %195 = vector.broadcast %cst_69 : f32 to vector<8x32xf32>
    %196 = arith.subf %195, %194 : vector<8x32xf32>
    %197 = math.exp %196 : vector<8x32xf32>
    %cst_70 = arith.constant 1.000000e+00 : f32
    %198 = vector.broadcast %cst_70 : f32 to vector<8x32xf32>
    %199 = arith.addf %198, %197 : vector<8x32xf32>
    %cst_71 = arith.constant 1.000000e+00 : f32
    %200 = vector.broadcast %cst_71 : f32 to vector<8x32xf32>
    %201 = arith.divf %200, %199 : vector<8x32xf32>
    %202 = vector.extract_strided_slice %185 {offsets = [0, 64], sizes = [8, 32], strides = [1, 1]} : vector<8x128xf32> to vector<8x32xf32>
    %203 = math.tanh %202 : vector<8x32xf32>
    %204 = vector.extract_strided_slice %185 {offsets = [0, 96], sizes = [8, 32], strides = [1, 1]} : vector<8x128xf32> to vector<8x32xf32>
    %cst_72 = arith.constant 0.000000e+00 : f32
    %205 = vector.broadcast %cst_72 : f32 to vector<8x32xf32>
    %206 = arith.subf %205, %204 : vector<8x32xf32>
    %207 = math.exp %206 : vector<8x32xf32>
    %cst_73 = arith.constant 1.000000e+00 : f32
    %208 = vector.broadcast %cst_73 : f32 to vector<8x32xf32>
    %209 = arith.addf %208, %207 : vector<8x32xf32>
    %cst_74 = arith.constant 1.000000e+00 : f32
    %210 = vector.broadcast %cst_74 : f32 to vector<8x32xf32>
    %211 = arith.divf %210, %209 : vector<8x32xf32>
    %212 = arith.mulf %201, %171 : vector<8x32xf32>
    %213 = arith.mulf %193, %203 : vector<8x32xf32>
    %214 = arith.addf %212, %213 : vector<8x32xf32>
    %215 = math.tanh %214 : vector<8x32xf32>
    %216 = arith.mulf %211, %215 : vector<8x32xf32>
    %c4_i32 = arith.constant 4 : i32
    %217 = vector.broadcast %c4_i32 : i32 to vector<8x1xi32>
    %218 = arith.cmpi sgt, %8, %217 : vector<8x1xi32>
    %cst_75 = arith.constant 0.000000e+00 : f32
    %219 = vector.shape_cast %218 : vector<8x1xi1> to vector<8x1xi1>
    %220 = vector.broadcast %219 : vector<8x1xi1> to vector<8x32xi1>
    %221 = vector.broadcast %cst_75 : f32 to vector<8x32xf32>
    %222 = arith.select %220, %216, %221 : vector<8x32xi1>, vector<8x32xf32>
    %c4 = arith.constant 4 : index
    %c0_76 = arith.constant 0 : index
    %c0_77 = arith.constant 0 : index
    %223 = vector.load %arg6[%c4, %c0_76, %c0_77] : memref<8x8x32xf32, #tpu.memory_space<vmem>>, vector<1x8x32xf32>
    %224 = vector.shape_cast %223 : vector<1x8x32xf32> to vector<8x32xf32>
    %225 = vector.shape_cast %222 : vector<8x32xf32> to vector<1x8x32xf32>
    tpu.vector_store %arg6[%c4, %c0_76, %c0_77], %225 {strides = array<i32>} : memref<8x8x32xf32, #tpu.memory_space<vmem>>, vector<1x8x32xf32>,
    %226 = vector.extract_strided_slice %6 {offsets = [40, 0], sizes = [8, 128], strides = [1, 1]} : vector<64x128xf32> to vector<8x128xf32>
    %cst_78 = arith.constant dense<0.000000e+00> : vector<8x128xf32>
    %227 = tpu.matmul %216, %7, %cst_78 {dimension_numbers = #tpu.dot_dimension_numbers<[1], [0], [0], [1], [0, 0, 1, 1], [], []>} : vector<8x32xf32>, vector<32x128xf32>, vector<8x128xf32> -> vector<8x128xf32>
    %228 = arith.addf %226, %227 : vector<8x128xf32>
    %229 = vector.extract_strided_slice %228 {offsets = [0, 0], sizes = [8, 32], strides = [1, 1]} : vector<8x128xf32> to vector<8x32xf32>
    %cst_79 = arith.constant 0.000000e+00 : f32
    %230 = vector.broadcast %cst_79 : f32 to vector<8x32xf32>
    %231 = arith.subf %230, %229 : vector<8x32xf32>
    %232 = math.exp %231 : vector<8x32xf32>
    %cst_80 = arith.constant 1.000000e+00 : f32
    %233 = vector.broadcast %cst_80 : f32 to vector<8x32xf32>
    %234 = arith.addf %233, %232 : vector<8x32xf32>
    %cst_81 = arith.constant 1.000000e+00 : f32
    %235 = vector.broadcast %cst_81 : f32 to vector<8x32xf32>
    %236 = arith.divf %235, %234 : vector<8x32xf32>
    %237 = vector.extract_strided_slice %228 {offsets = [0, 32], sizes = [8, 32], strides = [1, 1]} : vector<8x128xf32> to vector<8x32xf32>
    %cst_82 = arith.constant 0.000000e+00 : f32
    %238 = vector.broadcast %cst_82 : f32 to vector<8x32xf32>
    %239 = arith.subf %238, %237 : vector<8x32xf32>
    %240 = math.exp %239 : vector<8x32xf32>
    %cst_83 = arith.constant 1.000000e+00 : f32
    %241 = vector.broadcast %cst_83 : f32 to vector<8x32xf32>
    %242 = arith.addf %241, %240 : vector<8x32xf32>
    %cst_84 = arith.constant 1.000000e+00 : f32
    %243 = vector.broadcast %cst_84 : f32 to vector<8x32xf32>
    %244 = arith.divf %243, %242 : vector<8x32xf32>
    %245 = vector.extract_strided_slice %228 {offsets = [0, 64], sizes = [8, 32], strides = [1, 1]} : vector<8x128xf32> to vector<8x32xf32>
    %246 = math.tanh %245 : vector<8x32xf32>
    %247 = vector.extract_strided_slice %228 {offsets = [0, 96], sizes = [8, 32], strides = [1, 1]} : vector<8x128xf32> to vector<8x32xf32>
    %cst_85 = arith.constant 0.000000e+00 : f32
    %248 = vector.broadcast %cst_85 : f32 to vector<8x32xf32>
    %249 = arith.subf %248, %247 : vector<8x32xf32>
    %250 = math.exp %249 : vector<8x32xf32>
    %cst_86 = arith.constant 1.000000e+00 : f32
    %251 = vector.broadcast %cst_86 : f32 to vector<8x32xf32>
    %252 = arith.addf %251, %250 : vector<8x32xf32>
    %cst_87 = arith.constant 1.000000e+00 : f32
    %253 = vector.broadcast %cst_87 : f32 to vector<8x32xf32>
    %254 = arith.divf %253, %252 : vector<8x32xf32>
    %255 = arith.mulf %244, %214 : vector<8x32xf32>
    %256 = arith.mulf %236, %246 : vector<8x32xf32>
    %257 = arith.addf %255, %256 : vector<8x32xf32>
    %258 = math.tanh %257 : vector<8x32xf32>
    %259 = arith.mulf %254, %258 : vector<8x32xf32>
    %c5_i32 = arith.constant 5 : i32
    %260 = vector.broadcast %c5_i32 : i32 to vector<8x1xi32>
    %261 = arith.cmpi sgt, %8, %260 : vector<8x1xi32>
    %cst_88 = arith.constant 0.000000e+00 : f32
    %262 = vector.shape_cast %261 : vector<8x1xi1> to vector<8x1xi1>
    %263 = vector.broadcast %262 : vector<8x1xi1> to vector<8x32xi1>
    %264 = vector.broadcast %cst_88 : f32 to vector<8x32xf32>
    %265 = arith.select %263, %259, %264 : vector<8x32xi1>, vector<8x32xf32>
    %c5 = arith.constant 5 : index
    %c0_89 = arith.constant 0 : index
    %c0_90 = arith.constant 0 : index
    %266 = vector.load %arg6[%c5, %c0_89, %c0_90] : memref<8x8x32xf32, #tpu.memory_space<vmem>>, vector<1x8x32xf32>
    %267 = vector.shape_cast %266 : vector<1x8x32xf32> to vector<8x32xf32>
    %268 = vector.shape_cast %265 : vector<8x32xf32> to vector<1x8x32xf32>
    tpu.vector_store %arg6[%c5, %c0_89, %c0_90], %268 {strides = array<i32>} : memref<8x8x32xf32, #tpu.memory_space<vmem>>, vector<1x8x32xf32>,
    %269 = vector.extract_strided_slice %6 {offsets = [48, 0], sizes = [8, 128], strides = [1, 1]} : vector<64x128xf32> to vector<8x128xf32>
    %cst_91 = arith.constant dense<0.000000e+00> : vector<8x128xf32>
    %270 = tpu.matmul %259, %7, %cst_91 {dimension_numbers = #tpu.dot_dimension_numbers<[1], [0], [0], [1], [0, 0, 1, 1], [], []>} : vector<8x32xf32>, vector<32x128xf32>, vector<8x128xf32> -> vector<8x128xf32>
    %271 = arith.addf %269, %270 : vector<8x128xf32>
    %272 = vector.extract_strided_slice %271 {offsets = [0, 0], sizes = [8, 32], strides = [1, 1]} : vector<8x128xf32> to vector<8x32xf32>
    %cst_92 = arith.constant 0.000000e+00 : f32
    %273 = vector.broadcast %cst_92 : f32 to vector<8x32xf32>
    %274 = arith.subf %273, %272 : vector<8x32xf32>
    %275 = math.exp %274 : vector<8x32xf32>
    %cst_93 = arith.constant 1.000000e+00 : f32
    %276 = vector.broadcast %cst_93 : f32 to vector<8x32xf32>
    %277 = arith.addf %276, %275 : vector<8x32xf32>
    %cst_94 = arith.constant 1.000000e+00 : f32
    %278 = vector.broadcast %cst_94 : f32 to vector<8x32xf32>
    %279 = arith.divf %278, %277 : vector<8x32xf32>
    %280 = vector.extract_strided_slice %271 {offsets = [0, 32], sizes = [8, 32], strides = [1, 1]} : vector<8x128xf32> to vector<8x32xf32>
    %cst_95 = arith.constant 0.000000e+00 : f32
    %281 = vector.broadcast %cst_95 : f32 to vector<8x32xf32>
    %282 = arith.subf %281, %280 : vector<8x32xf32>
    %283 = math.exp %282 : vector<8x32xf32>
    %cst_96 = arith.constant 1.000000e+00 : f32
    %284 = vector.broadcast %cst_96 : f32 to vector<8x32xf32>
    %285 = arith.addf %284, %283 : vector<8x32xf32>
    %cst_97 = arith.constant 1.000000e+00 : f32
    %286 = vector.broadcast %cst_97 : f32 to vector<8x32xf32>
    %287 = arith.divf %286, %285 : vector<8x32xf32>
    %288 = vector.extract_strided_slice %271 {offsets = [0, 64], sizes = [8, 32], strides = [1, 1]} : vector<8x128xf32> to vector<8x32xf32>
    %289 = math.tanh %288 : vector<8x32xf32>
    %290 = vector.extract_strided_slice %271 {offsets = [0, 96], sizes = [8, 32], strides = [1, 1]} : vector<8x128xf32> to vector<8x32xf32>
    %cst_98 = arith.constant 0.000000e+00 : f32
    %291 = vector.broadcast %cst_98 : f32 to vector<8x32xf32>
    %292 = arith.subf %291, %290 : vector<8x32xf32>
    %293 = math.exp %292 : vector<8x32xf32>
    %cst_99 = arith.constant 1.000000e+00 : f32
    %294 = vector.broadcast %cst_99 : f32 to vector<8x32xf32>
    %295 = arith.addf %294, %293 : vector<8x32xf32>
    %cst_100 = arith.constant 1.000000e+00 : f32
    %296 = vector.broadcast %cst_100 : f32 to vector<8x32xf32>
    %297 = arith.divf %296, %295 : vector<8x32xf32>
    %298 = arith.mulf %287, %257 : vector<8x32xf32>
    %299 = arith.mulf %279, %289 : vector<8x32xf32>
    %300 = arith.addf %298, %299 : vector<8x32xf32>
    %301 = math.tanh %300 : vector<8x32xf32>
    %302 = arith.mulf %297, %301 : vector<8x32xf32>
    %c6_i32 = arith.constant 6 : i32
    %303 = vector.broadcast %c6_i32 : i32 to vector<8x1xi32>
    %304 = arith.cmpi sgt, %8, %303 : vector<8x1xi32>
    %cst_101 = arith.constant 0.000000e+00 : f32
    %305 = vector.shape_cast %304 : vector<8x1xi1> to vector<8x1xi1>
    %306 = vector.broadcast %305 : vector<8x1xi1> to vector<8x32xi1>
    %307 = vector.broadcast %cst_101 : f32 to vector<8x32xf32>
    %308 = arith.select %306, %302, %307 : vector<8x32xi1>, vector<8x32xf32>
    %c6 = arith.constant 6 : index
    %c0_102 = arith.constant 0 : index
    %c0_103 = arith.constant 0 : index
    %309 = vector.load %arg6[%c6, %c0_102, %c0_103] : memref<8x8x32xf32, #tpu.memory_space<vmem>>, vector<1x8x32xf32>
    %310 = vector.shape_cast %309 : vector<1x8x32xf32> to vector<8x32xf32>
    %311 = vector.shape_cast %308 : vector<8x32xf32> to vector<1x8x32xf32>
    tpu.vector_store %arg6[%c6, %c0_102, %c0_103], %311 {strides = array<i32>} : memref<8x8x32xf32, #tpu.memory_space<vmem>>, vector<1x8x32xf32>,
    %312 = vector.extract_strided_slice %6 {offsets = [56, 0], sizes = [8, 128], strides = [1, 1]} : vector<64x128xf32> to vector<8x128xf32>
    %cst_104 = arith.constant dense<0.000000e+00> : vector<8x128xf32>
    %313 = tpu.matmul %302, %7, %cst_104 {dimension_numbers = #tpu.dot_dimension_numbers<[1], [0], [0], [1], [0, 0, 1, 1], [], []>} : vector<8x32xf32>, vector<32x128xf32>, vector<8x128xf32> -> vector<8x128xf32>
    %314 = arith.addf %312, %313 : vector<8x128xf32>
    %315 = vector.extract_strided_slice %314 {offsets = [0, 0], sizes = [8, 32], strides = [1, 1]} : vector<8x128xf32> to vector<8x32xf32>
    %cst_105 = arith.constant 0.000000e+00 : f32
    %316 = vector.broadcast %cst_105 : f32 to vector<8x32xf32>
    %317 = arith.subf %316, %315 : vector<8x32xf32>
    %318 = math.exp %317 : vector<8x32xf32>
    %cst_106 = arith.constant 1.000000e+00 : f32
    %319 = vector.broadcast %cst_106 : f32 to vector<8x32xf32>
    %320 = arith.addf %319, %318 : vector<8x32xf32>
    %cst_107 = arith.constant 1.000000e+00 : f32
    %321 = vector.broadcast %cst_107 : f32 to vector<8x32xf32>
    %322 = arith.divf %321, %320 : vector<8x32xf32>
    %323 = vector.extract_strided_slice %314 {offsets = [0, 32], sizes = [8, 32], strides = [1, 1]} : vector<8x128xf32> to vector<8x32xf32>
    %cst_108 = arith.constant 0.000000e+00 : f32
    %324 = vector.broadcast %cst_108 : f32 to vector<8x32xf32>
    %325 = arith.subf %324, %323 : vector<8x32xf32>
    %326 = math.exp %325 : vector<8x32xf32>
    %cst_109 = arith.constant 1.000000e+00 : f32
    %327 = vector.broadcast %cst_109 : f32 to vector<8x32xf32>
    %328 = arith.addf %327, %326 : vector<8x32xf32>
    %cst_110 = arith.constant 1.000000e+00 : f32
    %329 = vector.broadcast %cst_110 : f32 to vector<8x32xf32>
    %330 = arith.divf %329, %328 : vector<8x32xf32>
    %331 = vector.extract_strided_slice %314 {offsets = [0, 64], sizes = [8, 32], strides = [1, 1]} : vector<8x128xf32> to vector<8x32xf32>
    %332 = math.tanh %331 : vector<8x32xf32>
    %333 = vector.extract_strided_slice %314 {offsets = [0, 96], sizes = [8, 32], strides = [1, 1]} : vector<8x128xf32> to vector<8x32xf32>
    %cst_111 = arith.constant 0.000000e+00 : f32
    %334 = vector.broadcast %cst_111 : f32 to vector<8x32xf32>
    %335 = arith.subf %334, %333 : vector<8x32xf32>
    %336 = math.exp %335 : vector<8x32xf32>
    %cst_112 = arith.constant 1.000000e+00 : f32
    %337 = vector.broadcast %cst_112 : f32 to vector<8x32xf32>
    %338 = arith.addf %337, %336 : vector<8x32xf32>
    %cst_113 = arith.constant 1.000000e+00 : f32
    %339 = vector.broadcast %cst_113 : f32 to vector<8x32xf32>
    %340 = arith.divf %339, %338 : vector<8x32xf32>
    %341 = arith.mulf %330, %300 : vector<8x32xf32>
    %342 = arith.mulf %322, %332 : vector<8x32xf32>
    %343 = arith.addf %341, %342 : vector<8x32xf32>
    %344 = math.tanh %343 : vector<8x32xf32>
    %345 = arith.mulf %340, %344 : vector<8x32xf32>
    %c7_i32 = arith.constant 7 : i32
    %346 = vector.broadcast %c7_i32 : i32 to vector<8x1xi32>
    %347 = arith.cmpi sgt, %8, %346 : vector<8x1xi32>
    %cst_114 = arith.constant 0.000000e+00 : f32
    %348 = vector.shape_cast %347 : vector<8x1xi1> to vector<8x1xi1>
    %349 = vector.broadcast %348 : vector<8x1xi1> to vector<8x32xi1>
    %350 = vector.broadcast %cst_114 : f32 to vector<8x32xf32>
    %351 = arith.select %349, %345, %350 : vector<8x32xi1>, vector<8x32xf32>
    %c7 = arith.constant 7 : index
    %c0_115 = arith.constant 0 : index
    %c0_116 = arith.constant 0 : index
    %352 = vector.load %arg6[%c7, %c0_115, %c0_116] : memref<8x8x32xf32, #tpu.memory_space<vmem>>, vector<1x8x32xf32>
    %353 = vector.shape_cast %352 : vector<1x8x32xf32> to vector<8x32xf32>
    %354 = vector.shape_cast %351 : vector<8x32xf32> to vector<1x8x32xf32>
    tpu.vector_store %arg6[%c7, %c0_115, %c0_116], %354 {strides = array<i32>} : memref<8x8x32xf32, #tpu.memory_space<vmem>>, vector<1x8x32xf32>,
    return
  }
  func.func @transform_0(%arg0: i32) -> (i32, i32) {
    %c0_i32 = arith.constant 0 : i32
    %c0_i32_0 = arith.constant 0 : i32
    return %arg0, %c0_i32 : i32, i32
  }
  func.func @transform_1(%arg0: i32) -> (i32, i32, i32) {
    %c0_i32 = arith.constant 0 : i32
    %c0_i32_0 = arith.constant 0 : i32
    %c0_i32_1 = arith.constant 0 : i32
    return %c0_i32, %arg0, %c0_i32_0 : i32, i32, i32
  }
  func.func @transform_2(%arg0: i32) -> (i32, i32) {
    %c0_i32 = arith.constant 0 : i32
    %c0_i32_0 = arith.constant 0 : i32
    %c0_i32_1 = arith.constant 0 : i32
    return %c0_i32, %c0_i32_0 : i32, i32
  }
  func.func @transform_3(%arg0: i32) -> (i32, i32) {
    %c0_i32 = arith.constant 0 : i32
    %c0_i32_0 = arith.constant 0 : i32
    %c0_i32_1 = arith.constant 0 : i32
    return %c0_i32, %c0_i32_0 : i32, i32
  }
  func.func @transform_4(%arg0: i32) -> (i32, i32) {
    %c0_i32 = arith.constant 0 : i32
    %c0_i32_0 = arith.constant 0 : i32
    %c0_i32_1 = arith.constant 0 : i32
    return %c0_i32, %c0_i32_0 : i32, i32
  }
  func.func @transform_5(%arg0: i32) -> (i32, i32, i32) {
    %c0_i32 = arith.constant 0 : i32
    %c0_i32_0 = arith.constant 0 : i32
    %c0_i32_1 = arith.constant 0 : i32
    return %c0_i32, %arg0, %c0_i32_0 : i32, i32, i32
  }
}

</mosaic_0001>

<bundles_post_ra>
// kernel: tpu_custom_call.1
= control target key start
LH: loop header
LB: loop body
LE: loop exit
PB: predicated region body
PF: predicated region fallthrough
CT: control target
= control target key end

     0   :  { %10 = vsyncpa [#allocation3], 0  ;;  %s1739_s0 = inlined_call_operand.vmem [shape: s32[8,1], index: 0, kind: input, shape index: {}]   ;;  %s1740_s1 = inlined_call_operand.hbm [shape: f32[8,8,16], index: 1, kind: input, shape index: {}]   ;;  %s1741_s2 = inlined_call_operand.hbm [shape: f32[16,128], index: 2, kind: input, shape index: {}]   ;;  %s1742_s3 = inlined_call_operand.hbm [shape: f32[32,128], index: 3, kind: input, shape index: {}]   ;;  %s1743_s4 = inlined_call_operand.vmem [shape: f32[1,128], index: 4, kind: input, shape index: {}]   ;;  %s1744_s5 = inlined_call_operand.hbm [shape: f32[8,8,32], index: 5, kind: output, shape index: {}]  }
   0x1   :  { %11 = vsyncpa [#allocation6], 0 }
   0x2   :  { %12 = vsyncpa [#allocation4], 0  ;;  %s1467_s18 = smov [#allocation5]   ;;  %s1468_s20 = smov [#allocation2]  }
   0x3   :  { %s32_s19 = sshll.u32 %s1467_s18, 4  ;;  %s20_s21 = sshll.u32 %s1468_s20, 4  ;;  %s33_s19 = int_to_ptr.vmem [resolvable:$true] %s32_s19  ;;  %s21_s21 = int_to_ptr.vmem [resolvable:$true] %s20_s21 }
   0x4   :  { %s1389_s22 = scalar_lea.vmem %s33_s19, 256  ;;  %p1394_p1 = scmp.lt.s32.totalorder %s33_s19, %s33_s19 }
   0x5   :  { %p1390_p0 = scmp.ne.s32.totalorder %s33_s19, %s1389_s22  ;;  %p1395_p2 = scmp.lt.s32.totalorder %s1389_s22, %s1389_s22 }
   0x7   :  { %p1396_p3 = por %p1395_p2, %p1394_p1 }
   0x9   :  { %p1397_p4 = pnand %p1396_p3, %p1390_p0 }
   0xb   :  { %1400 = shalt.err (!%p1397_p4)
}
   0xc   :  { %s1469_s23 = smov 128   ;;  %s1470_s24 = smov 8  }
   0xd   :  { %38 = dma.hbm_to_vmem [thread:$0]  %s1741_s2, 256, %s33_s19, [#allocation6], %s1469_s23, %s1469_s23, %s1470_s24  }
   0xe   :  { %s1409_s27 = scalar_lea.vmem %s21_s21, 1024  ;;  %p1414_p6 = scmp.lt.s32.totalorder %s21_s21, %s21_s21 }
   0xf   :  { %p1410_p5 = scmp.ne.s32.totalorder %s21_s21, %s1409_s27  ;;  %p1415_p7 = scmp.lt.s32.totalorder %s1409_s27, %s1409_s27 }
  0x11   :  { %p1416_p8 = por %p1415_p7, %p1414_p6 }
  0x13   :  { %p1417_p9 = pnand %p1416_p8, %p1410_p5 }
  0x15   :  { %1420 = shalt.err (!%p1417_p9)
}
  0x16   :  { %26 = dma.hbm_to_vmem [thread:$0]  %s1740_s1, 1024, %s21_s21, [#allocation3], %s1469_s23, %s1469_s23, %s1470_s24  }
  0x17   :  { %s1471_s30 = smov [#allocation7]  }
  0x18   :  { %s44_s6 = sshll.u32 %s1471_s30, 4  ;;  %s45_s6 = int_to_ptr.vmem [resolvable:$true] %s44_s6 }
  0x19   :  { %s1429_s7 = scalar_lea.vmem %s45_s6, 512  ;;  %p1434_p11 = scmp.lt.s32.totalorder %s45_s6, %s45_s6 }
  0x1a   :  { %p1430_p10 = scmp.ne.s32.totalorder %s45_s6, %s1429_s7  ;;  %p1435_p12 = scmp.lt.s32.totalorder %s1429_s7, %s1429_s7 }
  0x1c   :  { %p1436_p13 = por %p1435_p12, %p1434_p11 }
  0x1e   :  { %p1437_p0 = pnand %p1436_p13, %p1430_p10 }
  0x20   :  { %1440 = shalt.err (!%p1437_p0)
}
  0x21   :  { %50 = dma.hbm_to_vmem [thread:$0]  %s1742_s3, 512, %s45_s6, [#allocation6], %s1469_s23, %s1469_s23, %s1470_s24  }
  0x22   :  { %1461 = dma.done.wait [#allocation3], 1024  }
  0x23   :  { %1462 = vsyncadd [#allocation3], 4294966272 }
  0x24   :  { %1463 = dma.done.wait [#allocation6], 768  }
  0x25   :  { %1464 = vsyncadd [#allocation6], 4294966528  ;;  %v1472_v0 = vmov 0.0   ;;  %vm1473_vm0 = vmmov 0   ;;  %v71_v1 = vld [vmem:[#allocation5 + $0x8] sm:$0xff]  ;;  %v70_v3 = vld [vmem:[#allocation5] sm:$0xff] }
  0x26   :  { %1216 = vmatprep.subr.mxu1 %v1472_v0  ;;  %1224 = vmatprep.mubr.msk.f32.mxu1 %vm1473_vm0, %v1472_v0  ;;  %v1529_v2 = vld [vmem:[#allocation7 + $0x18] sm:$0xff]  ;;  %v1532_v4 = vld [vmem:[#allocation7 + $0x10] sm:$0xff]  ;;  %vm79_vm1 = vcmask 130048   ;;  %v1536_v7 = vld [vmem:[#allocation7 + $0x8] sm:$0xff]  ;;  %s1474_s9 = smov 64   ;;  %vm214_vm2 = vcmask 261120  }
  0x27   :  { %1200 = vmatprep.subr.mxu0 %v71_v1  ;;  %1217 = vmatpush3.msra.mxu1 %v1529_v2  ;;  %v62_v5 = vld [vmem:[#allocation2] sm:$0xff]  ;;  %v63_v6 = vld [vmem:[#allocation2 + $0x8] sm:$0xff]  ;;  %v1541_v8 = vld [vmem:[#allocation7] sm:$0xff] }
  0x28   :  { %1201 = vmatpush3.msra.mxu0 %v71_v1  ;;  %1218 = vmatprep.subr.mxu1 %v1472_v0  ;;  %v1570_v10 = vld [vmem:[%s1743_s4] ss:$0 sm:$0xff]  ;;  %s1475_s4 = smov 32   ;;  %v64_v46 = vld [vmem:[#allocation2 + $0x10] sm:$0xff]  ;;  %v65_v47 = vld [vmem:[#allocation2 + $0x18] sm:$0xff] }
  0x29   :  { %1202 = vmatprep.subr.mxu0 %v70_v3  ;;  %1219 = vmatpush3.msra.mxu1 %v1532_v4  ;;  %v66_v48 = vld [vmem:[#allocation2 + $0x20] sm:$0xff]  ;;  %v67_v49 = vld [vmem:[#allocation2 + $0x28] sm:$0xff]  ;;  %v68_v50 = vld [vmem:[#allocation2 + $0x30] sm:$0xff] }
  0x2a   :  { %1203 = vmatpush3.msra.mxu0 %v70_v3  ;;  %1204 = vmatprep.mubr.msk.f32.mxu0 %vm79_vm1, %v62_v5  ;;  %v69_v51 = vld [vmem:[#allocation2 + $0x38] sm:$0xff] }
  0x2b   :  { %1220 = vmatprep.subr.mxu1 %v1472_v0  ;;  %1205 = vmatmul.mubr.msk.f32.vlgmr.msra.gmra.mxu0 %vm79_vm1, %v63_v6 }
  0x2c   :  { %1221 = vmatpush3.msra.mxu1 %v1536_v7  ;;  %1238 = vmatprep.subr.mxu0 %v1472_v0 }
  0x2d   :  { %1222 = vmatprep.subr.mxu1 %v1472_v0  ;;  %1239 = vmatpush3.msra.mxu0 %v1529_v2 }
  0x2e   :  { %1223 = vmatpush3.msra.mxu1 %v1541_v8  ;;  %1240 = vmatprep.subr.mxu0 %v1472_v0 }
  0x2f   :  { %1225 = vmatmul.mubr.f32.vlgmr.msra.gmra.mxu1 %v1472_v0  ;;  %1227 = vmatprep.subr.mxu1 %v1472_v0 }
  0x30   :  { %1228 = vmatpush3.msra.mxu1 %v1529_v2  ;;  %1235 = vmatprep.mubr.msk.f32.mxu1 %vm1473_vm0, %v1472_v0 }
  0x31   :  { %1229 = vmatprep.subr.mxu1 %v1472_v0  ;;  %1241 = vmatpush3.msra.mxu0 %v1532_v4 }
  0x32   :  { %1230 = vmatpush3.msra.mxu1 %v1532_v4  ;;  %1242 = vmatprep.subr.mxu0 %v1472_v0 }
  0x33   :  { %1231 = vmatprep.subr.mxu1 %v1472_v0  ;;  %1243 = vmatpush3.msra.mxu0 %v1536_v7 }
  0x34   :  { %1232 = vmatpush3.msra.mxu1 %v1536_v7  ;;  %1244 = vmatprep.subr.mxu0 %v1472_v0 }
  0x35   :  { %1233 = vmatprep.subr.mxu1 %v1472_v0  ;;  %1245 = vmatpush3.msra.mxu0 %v1541_v8 }
  0x36   :  { %1234 = vmatpush3.msra.mxu1 %v1541_v8  ;;  %1260 = vmatprep.subr.mxu0 %v1472_v0 }
  0x37   :  { %1249 = vmatprep.subr.mxu1 %v1472_v0  ;;  %1207 = vmatprep.mubr.msk.f32.mxu0 %vm79_vm1, %v64_v46 }
  0x38   :  { %1208 = vmatmul.mubr.msk.f32.gmra.mxu0 %vm79_vm1, %v65_v47 }
  0x39   :  { %1210 = vmatprep.mubr.msk.f32.mxu0 %vm79_vm1, %v66_v48 }
  0x3c   :  { %1211 = vmatmul.mubr.msk.f32.gmra.mxu0 %vm79_vm1, %v67_v49 }
  0x3d   :  { %1213 = vmatprep.mubr.msk.f32.mxu0 %vm79_vm1, %v68_v50 }
  0x40   :  { %1214 = vmatmul.mubr.msk.f32.gmra.mxu0 %vm79_vm1, %v69_v51 }
  0x41   :  { %1246 = vmatprep.mubr.msk.f32.mxu0 %vm1473_vm0, %v1472_v0 }
  0xeb   :  { %v1206_v9 = vpop.f32.mrf.mxu0 }
  0xec   :  { %v176_v31 = vadd.f32 %v1206_v9, %v1570_v10 }
  0xed   :  { %v170_v11 = vpop.f32.mrf.mxu0 }
  0xee   :  { %v171_v12 = vadd.f32 %v1570_v10, %v170_v11 }
  0xef   :  { %v284_v13 = vpop.f32.mrf.mxu1 }
  0xf0   :  { %v288_v14 = vadd.f32 %v284_v13, %v171_v12 }
  0xf1   :  { %v1226_v15 = vpop.f32.mrf.mxu1 }
  0xf2   :  { %1317 = vtanh.f32 %v288_v14  ;;  %v289_v17 = vsub.f32 0.0, %v288_v14 }
  0xf4   :  { %v290_v18 = vmul.f32 1.442695, %v289_v17 }
  0xf6   :  { %1319 = vpow2.f32 %v290_v18 }
  0xf8   :  { %v1209_v56 = vpop.f32.mrf.mxu0 }
  0xfa   :  { %v180_v57 = vpop.f32.mrf.mxu0 }
  0xfb   :  { %v181_v62 = vadd.f32 %v1570_v10, %v180_v57 }
  0xfc   :  { %v1618_v58 = vpop.f32.mrf.mxu0 }
  0xfe   :  { %v1620_v59 = vpop.f32.mrf.mxu0 }
  0xff   :  { %v1318_v16 = vpop.eup %1317 }
 0x100   :  { %298 = vrot.lane.b32.xlu0 %v1318_v16, %s1474_s9  ;;  %v1622_v60 = vpop.f32.mrf.mxu0 }
 0x102   :  { %v1624_v61 = vpop.f32.mrf.mxu0 }
 0x103   :  { %v1320_v19 = vpop.eup %1319 }
 0x104   :  { %v292_v20 = vadd.f32 1.0, %v1320_v19 }
 0x106   :  { %1321 = vrcp.f32 %v292_v20 }
 0x113   :  { %v1322_v21 = vpop.eup %1321 }
 0x114   :  { %v296_v24 = vmul.f32 0.0, %v1322_v21 }
 0x172   :  { %v299_v22 = vpop.permute.xlu0 %298 }
 0x173   :  { %v301_v23 = vmul.f32 %v1322_v21, %v299_v22 }
 0x175   :  { %303 = vrot.lane.b32.xlu0 %v301_v23, %s1475_s4  ;;  %v186_v23 = vadd.f32 %v1209_v56, %v1570_v10 }
 0x1e7   :  { %v304_v25 = vpop.permute.xlu0 %303 }
 0x1e8   :  { %v306_v26 = vadd.f32 %v304_v25, %v296_v24 }
 0x1ea   :  { %1323 = vtanh.f32 %v306_v26 }
 0x1f7   :  { %v1324_v27 = vpop.eup %1323 }
 0x1f8   :  { %309 = vrot.lane.b32.xlu1 %v1324_v27, %s1474_s9 }
 0x26a   :  { %v310_v28 = vpop.permute.xlu1 %309 }
 0x26b   :  { %v1576_v29 = vmul.f32 %v1322_v21, %v310_v28 }
 0x26d   :  { %326 = vrot.lane.b32.xlu1 %v1576_v29, %s1475_s4 }
 0x2df   :  { %v327_v30 = vpop.permute.xlu1 %326 }
 0x2e0   :  { %1236 = vmatmul.mubr.msk.f32.vlgmr.msra.gmra.mxu1 %vm214_vm2, %v327_v30 }
 0x2e1   :  { %1250 = vmatpush3.msra.mxu1 %v1529_v2  ;;  %1257 = vmatprep.mubr.msk.f32.mxu1 %vm1473_vm0, %v1472_v0 }
 0x2e2   :  { %1251 = vmatprep.subr.mxu1 %v1472_v0 }
 0x2e3   :  { %1252 = vmatpush3.msra.mxu1 %v1532_v4 }
 0x2e4   :  { %1253 = vmatprep.subr.mxu1 %v1472_v0 }
 0x2e5   :  { %1254 = vmatpush3.msra.mxu1 %v1536_v7 }
 0x2e6   :  { %1255 = vmatprep.subr.mxu1 %v1472_v0 }
 0x2e7   :  { %1256 = vmatpush3.msra.mxu1 %v1541_v8 }
 0x2e8   :  { %1271 = vmatprep.subr.mxu1 %v1472_v0 }
 0x3a0   :  { %v396_v32 = vpop.f32.mrf.mxu1 }
 0x3a1   :  { %v400_v33 = vadd.f32 %v396_v32, %v176_v31 }
 0x3a2   :  { %v1237_v34 = vpop.f32.mrf.mxu1 }
 0x3a3   :  { %1325 = vtanh.f32 %v400_v33  ;;  %v401_v36 = vsub.f32 0.0, %v400_v33 }
 0x3a5   :  { %v402_v37 = vmul.f32 1.442695, %v401_v36 }
 0x3a7   :  { %1327 = vpow2.f32 %v402_v37 }
 0x3b0   :  { %v1326_v35 = vpop.eup %1325 }
 0x3b1   :  { %410 = vrot.lane.b32.xlu0 %v1326_v35, %s1474_s9 }
 0x3b4   :  { %v1328_v38 = vpop.eup %1327 }
 0x3b5   :  { %v404_v39 = vadd.f32 1.0, %v1328_v38 }
 0x3b7   :  { %1329 = vrcp.f32 %v404_v39 }
 0x3c4   :  { %v1330_v40 = vpop.eup %1329 }
 0x3c5   :  { %v408_v43 = vmul.f32 %v1330_v40, %v306_v26 }
 0x423   :  { %v411_v41 = vpop.permute.xlu0 %410 }
 0x424   :  { %v413_v42 = vmul.f32 %v1330_v40, %v411_v41 }
 0x426   :  { %415 = vrot.lane.b32.xlu1 %v413_v42, %s1475_s4 }
 0x498   :  { %v416_v44 = vpop.permute.xlu1 %415 }
 0x499   :  { %v418_v45 = vadd.f32 %v416_v44, %v408_v43  ;;  %v191_v43 = vadd.f32 %v1570_v10, %v1620_v59 }
 0x49b   :  { %1331 = vtanh.f32 %v418_v45 }
 0x4a8   :  { %v1332_v52 = vpop.eup %1331 }
 0x4a9   :  { %421 = vrot.lane.b32.xlu0 %v1332_v52, %s1474_s9 }
 0x51b   :  { %v422_v53 = vpop.permute.xlu0 %421 }
 0x51c   :  { %v1603_v54 = vmul.f32 %v1330_v40, %v422_v53 }
 0x51e   :  { %439 = vrot.lane.b32.xlu1 %v1603_v54, %s1475_s4 }
 0x590   :  { %v440_v55 = vpop.permute.xlu1 %439 }
 0x591   :  { %1247 = vmatmul.mubr.msk.f32.vlgmr.msra.gmra.mxu0 %vm214_vm2, %v440_v55 }
 0x592   :  { %1261 = vmatpush3.msra.mxu0 %v1529_v2  ;;  %1268 = vmatprep.mubr.msk.f32.mxu0 %vm1473_vm0, %v1472_v0 }
 0x593   :  { %1262 = vmatprep.subr.mxu0 %v1472_v0 }
 0x594   :  { %1263 = vmatpush3.msra.mxu0 %v1532_v4 }
 0x595   :  { %1264 = vmatprep.subr.mxu0 %v1472_v0 }
 0x596   :  { %1265 = vmatpush3.msra.mxu0 %v1536_v7 }
 0x597   :  { %1266 = vmatprep.subr.mxu0 %v1472_v0 }
 0x598   :  { %1267 = vmatpush3.msra.mxu0 %v1541_v8 }
 0x599   :  { %1282 = vmatprep.subr.mxu0 %v1472_v0 }
 0x651   :  { %v509_v63 = vpop.f32.mrf.mxu0 }
 0x652   :  { %v513_v1 = vadd.f32 %v509_v63, %v181_v62 }
 0x653   :  { %v1248_v3 = vpop.f32.mrf.mxu0 }
 0x654   :  { %1333 = vtanh.f32 %v513_v1  ;;  %v514_v6 = vsub.f32 0.0, %v513_v1 }
 0x656   :  { %v515_v9 = vmul.f32 1.442695, %v514_v6 }
 0x658   :  { %1335 = vpow2.f32 %v515_v9 }
 0x661   :  { %v1334_v5 = vpop.eup %1333 }
 0x662   :  { %523 = vrot.lane.b32.xlu0 %v1334_v5, %s1474_s9  ;;  %v196_v5 = vadd.f32 %v1618_v58, %v1570_v10 }
 0x665   :  { %v1336_v11 = vpop.eup %1335 }
 0x666   :  { %v517_v12 = vadd.f32 1.0, %v1336_v11 }
 0x668   :  { %1337 = vrcp.f32 %v517_v12 }
 0x675   :  { %v1338_v13 = vpop.eup %1337 }
 0x676   :  { %v521_v16 = vmul.f32 %v1338_v13, %v418_v45 }
 0x6d4   :  { %v524_v14 = vpop.permute.xlu0 %523 }
 0x6d5   :  { %v526_v15 = vmul.f32 %v1338_v13, %v524_v14 }
 0x6d7   :  { %528 = vrot.lane.b32.xlu1 %v526_v15, %s1475_s4 }
 0x749   :  { %v529_v17 = vpop.permute.xlu1 %528 }
 0x74a   :  { %v531_v18 = vadd.f32 %v529_v17, %v521_v16 }
 0x74c   :  { %1339 = vtanh.f32 %v531_v18 }
 0x759   :  { %v1340_v19 = vpop.eup %1339 }
 0x75a   :  { %534 = vrot.lane.b32.xlu0 %v1340_v19, %s1474_s9 }
 0x7cc   :  { %v535_v20 = vpop.permute.xlu0 %534 }
 0x7cd   :  { %v1630_v21 = vmul.f32 %v1338_v13, %v535_v20 }
 0x7cf   :  { %552 = vrot.lane.b32.xlu1 %v1630_v21, %s1475_s4 }
 0x841   :  { %v553_v22 = vpop.permute.xlu1 %552 }
 0x842   :  { %1258 = vmatmul.mubr.msk.f32.vlgmr.msra.gmra.mxu1 %vm214_vm2, %v553_v22  ;;  %v201_v22 = vadd.f32 %v1570_v10, %v1624_v61 }
 0x843   :  { %1272 = vmatpush3.msra.mxu1 %v1529_v2  ;;  %1279 = vmatprep.mubr.msk.f32.mxu1 %vm1473_vm0, %v1472_v0 }
 0x844   :  { %1273 = vmatprep.subr.mxu1 %v1472_v0 }
 0x845   :  { %1274 = vmatpush3.msra.mxu1 %v1532_v4 }
 0x846   :  { %1275 = vmatprep.subr.mxu1 %v1472_v0 }
 0x847   :  { %1276 = vmatpush3.msra.mxu1 %v1536_v7 }
 0x848   :  { %1277 = vmatprep.subr.mxu1 %v1472_v0 }
 0x849   :  { %1278 = vmatpush3.msra.mxu1 %v1541_v8 }
 0x84a   :  { %1293 = vmatprep.subr.mxu1 %v1472_v0 }
 0x902   :  { %v622_v24 = vpop.f32.mrf.mxu1 }
 0x903   :  { %v626_v25 = vadd.f32 %v622_v24, %v186_v23 }
 0x904   :  { %v1259_v26 = vpop.f32.mrf.mxu1 }
 0x905   :  { %1341 = vtanh.f32 %v626_v25  ;;  %v627_v28 = vsub.f32 0.0, %v626_v25 }
 0x907   :  { %v628_v30 = vmul.f32 1.442695, %v627_v28 }
 0x909   :  { %1343 = vpow2.f32 %v628_v30 }
 0x912   :  { %v1342_v27 = vpop.eup %1341 }
 0x913   :  { %636 = vrot.lane.b32.xlu0 %v1342_v27, %s1474_s9 }
 0x916   :  { %v1344_v31 = vpop.eup %1343 }
 0x917   :  { %v630_v32 = vadd.f32 1.0, %v1344_v31 }
 0x919   :  { %1345 = vrcp.f32 %v630_v32 }
 0x926   :  { %v1346_v33 = vpop.eup %1345 }
 0x927   :  { %v634_v36 = vmul.f32 %v1346_v33, %v531_v18 }
 0x985   :  { %v637_v34 = vpop.permute.xlu0 %636 }
 0x986   :  { %v639_v35 = vmul.f32 %v1346_v33, %v637_v34 }
 0x988   :  { %641 = vrot.lane.b32.xlu1 %v639_v35, %s1475_s4 }
 0x9fa   :  { %v642_v37 = vpop.permute.xlu1 %641 }
 0x9fb   :  { %v644_v38 = vadd.f32 %v642_v37, %v634_v36 }
 0x9fd   :  { %1347 = vtanh.f32 %v644_v38 }
 0xa0a   :  { %v1348_v39 = vpop.eup %1347 }
 0xa0b   :  { %647 = vrot.lane.b32.xlu0 %v1348_v39, %s1474_s9 }
 0xa7d   :  { %v648_v40 = vpop.permute.xlu0 %647 }
 0xa7e   :  { %v1649_v41 = vmul.f32 %v1346_v33, %v648_v40 }
 0xa80   :  { %665 = vrot.lane.b32.xlu1 %v1649_v41, %s1475_s4 }
 0xaf2   :  { %v666_v42 = vpop.permute.xlu1 %665 }
 0xaf3   :  { %1269 = vmatmul.mubr.msk.f32.vlgmr.msra.gmra.mxu0 %vm214_vm2, %v666_v42  ;;  %v1476_v42 = vmov 0  }
 0xaf4   :  { %1283 = vmatpush3.msra.mxu0 %v1529_v2  ;;  %1290 = vmatprep.mubr.msk.f32.mxu0 %vm1473_vm0, %v1472_v0 }
 0xaf5   :  { %1284 = vmatprep.subr.mxu0 %v1472_v0  ;;  %1315 = vset.pattern.permute.xlu0 %v1476_v42 }
 0xaf6   :  { %1285 = vmatpush3.msra.mxu0 %v1532_v4  ;;  %1316 = vset.pattern.permute.xlu1 %v1476_v42 }
 0xaf7   :  { %1286 = vmatprep.subr.mxu0 %v1472_v0 }
 0xaf8   :  { %1287 = vmatpush3.msra.mxu0 %v1536_v7 }
 0xaf9   :  { %1288 = vmatprep.subr.mxu0 %v1472_v0 }
 0xafa   :  { %1289 = vmatpush3.msra.mxu0 %v1541_v8 }
 0xbb3   :  { %v735_v44 = vpop.f32.mrf.mxu0 }
 0xbb4   :  { %v739_v45 = vadd.f32 %v735_v44, %v191_v43  ;;  %v206_v43 = vadd.f32 %v1622_v60, %v1570_v10 }
 0xbb5   :  { %v1270_v46 = vpop.f32.mrf.mxu0 }
 0xbb6   :  { %1349 = vtanh.f32 %v739_v45  ;;  %v740_v48 = vsub.f32 0.0, %v739_v45 }
 0xbb8   :  { %v741_v49 = vmul.f32 1.442695, %v740_v48 }
 0xbba   :  { %1351 = vpow2.f32 %v741_v49 }
 0xbc3   :  { %v1350_v47 = vpop.eup %1349 }
 0xbc4   :  { %749 = vrot.lane.b32.xlu0 %v1350_v47, %s1474_s9  ;;  %v213_v47 = vld [vmem:[%s1739_s0] sm:$0xff]  ;;  %s1477_s0 = smov [#allocation8]  }
 0xbc5   :  { %vm313_vm3 = vcmp.gt.s32.totalorder %v213_v47, 0  ;;  %vm651_vm4 = vcmp.gt.s32.totalorder %v213_v47, 3  ;;  %vm877_vm5 = vcmp.gt.s32.totalorder %v213_v47, 5  ;;  %vm1103_vm6 = vcmp.gt.s32.totalorder %v213_v47, 7  ;;  %s1121_s12 = sshll.u32 %s1477_s0, 4  ;;  %s1122_s12 = int_to_ptr.vmem [resolvable:$true] %s1121_s12 }
 0xbc6   :  { %v314_v49 = vsel %vm313_vm3, 1, %v1476_v42  ;;  %v1104_v10 = vsel %vm1103_vm6, 1, %v1476_v42  ;;  %vm425_vm7 = vcmp.gt.s32.totalorder %v213_v47, 1  ;;  %vm538_vm8 = vcmp.gt.s32.totalorder %v213_v47, 2  ;;  %s1441_s13 = scalar_lea.vmem %s1122_s12, 1024  ;;  %p1446_p2 = scmp.lt.s32.totalorder %s1122_s12, %s1122_s12 }
 0xbc7   :  { %v1352_v50 = vpop.eup %1351  ;;  %vm764_vm9 = vcmp.gt.s32.totalorder %v213_v47, 4  ;;  %vm990_vm10 = vcmp.gt.s32.totalorder %v213_v47, 6  ;;  %p1442_p1 = scmp.ne.s32.totalorder %s1122_s12, %s1441_s13  ;;  %p1447_p3 = scmp.lt.s32.totalorder %s1441_s13, %s1441_s13 }
 0xbc8   :  { %v743_v51 = vadd.f32 1.0, %v1352_v50  ;;  %v652_v50 = vsel %vm651_vm4, 1, %v1476_v42 }
 0xbc9   :  { %p1448_p4 = por %p1447_p3, %p1446_p2 }
 0xbca   :  { %1353 = vrcp.f32 %v743_v51  ;;  %v878_v51 = vsel %vm877_vm5, 1, %v1476_v42 }
 0xbcb   :  { %p1449_p5 = pnand %p1448_p4, %p1442_p1 }
 0xbd7   :  { %v1354_v52 = vpop.eup %1353 }
 0xbd8   :  { %v747_v56 = vmul.f32 %v1354_v52, %v644_v38 }
 0xc36   :  { %v750_v53 = vpop.permute.xlu0 %749 }
 0xc37   :  { %v752_v55 = vmul.f32 %v1354_v52, %v750_v53 }
 0xc39   :  { %754 = vrot.lane.b32.xlu1 %v752_v55, %s1475_s4 }
 0xcab   :  { %v755_v57 = vpop.permute.xlu1 %754 }
 0xcac   :  { %v757_v59 = vadd.f32 %v755_v57, %v747_v56 }
 0xcae   :  { %1355 = vtanh.f32 %v757_v59 }
 0xcbb   :  { %v1356_v62 = vpop.eup %1355 }
 0xcbc   :  { %760 = vrot.lane.b32.xlu0 %v1356_v62, %s1474_s9  ;;  %v426_v62 = vsel %vm425_vm7, 1, %v1476_v42 }
 0xd2e   :  { %v761_v63 = vpop.permute.xlu0 %760 }
 0xd2f   :  { %v1668_v1 = vmul.f32 %v1354_v52, %v761_v63  ;;  %v539_v63 = vsel %vm538_vm8, 1, %v1476_v42 }
 0xd31   :  { %778 = vrot.lane.b32.xlu1 %v1668_v1, %s1475_s4 }
 0xda3   :  { %v779_v3 = vpop.permute.xlu1 %778 }
 0xda4   :  { %1280 = vmatmul.mubr.msk.f32.vlgmr.msra.gmra.mxu1 %vm214_vm2, %v779_v3  ;;  %v765_v3 = vsel %vm764_vm9, 1, %v1476_v42 }
 0xda5   :  { %1294 = vmatpush3.msra.mxu1 %v1529_v2  ;;  %1301 = vmatprep.mubr.msk.f32.mxu1 %vm1473_vm0, %v1472_v0 }
 0xda6   :  { %1295 = vmatprep.subr.mxu1 %v1472_v0 }
 0xda7   :  { %1296 = vmatpush3.msra.mxu1 %v1532_v4 }
 0xda8   :  { %1297 = vmatprep.subr.mxu1 %v1472_v0 }
 0xda9   :  { %1298 = vmatpush3.msra.mxu1 %v1536_v7 }
 0xdaa   :  { %1299 = vmatprep.subr.mxu1 %v1472_v0 }
 0xdab   :  { %1300 = vmatpush3.msra.mxu1 %v1541_v8 }
 0xe64   :  { %v848_v6 = vpop.f32.mrf.mxu1 }
 0xe65   :  { %v852_v2 = vadd.f32 %v848_v6, %v196_v5 }
 0xe66   :  { %v1281_v9 = vpop.f32.mrf.mxu1 }
 0xe67   :  { %1357 = vtanh.f32 %v852_v2  ;;  %v853_v12 = vsub.f32 0.0, %v852_v2  ;;  %v991_v2 = vsel %vm990_vm10, 1, %v1476_v42 }
 0xe69   :  { %v854_v4 = vmul.f32 1.442695, %v853_v12 }
 0xe6b   :  { %1359 = vpow2.f32 %v854_v4 }
 0xe74   :  { %v1358_v11 = vpop.eup %1357 }
 0xe75   :  { %862 = vrot.lane.b32.xlu0 %v1358_v11, %s1474_s9 }
 0xe78   :  { %v1360_v13 = vpop.eup %1359 }
 0xe79   :  { %v856_v14 = vadd.f32 1.0, %v1360_v13 }
 0xe7b   :  { %1361 = vrcp.f32 %v856_v14 }
 0xe88   :  { %v1362_v7 = vpop.eup %1361 }
 0xe89   :  { %v860_v8 = vmul.f32 %v1362_v7, %v757_v59 }
 0xee7   :  { %v863_v0 = vpop.permute.xlu0 %862 }
 0xee8   :  { %v865_v15 = vmul.f32 %v1362_v7, %v863_v0 }
 0xeea   :  { %867 = vrot.lane.b32.xlu1 %v865_v15, %s1475_s4 }
 0xf5c   :  { %v868_v58 = vpop.permute.xlu1 %867 }
 0xf5d   :  { %v870_v16 = vadd.f32 %v868_v58, %v860_v8 }
 0xf5f   :  { %1363 = vtanh.f32 %v870_v16 }
 0xf6c   :  { %v1364_v17 = vpop.eup %1363 }
 0xf6d   :  { %873 = vrot.lane.b32.xlu0 %v1364_v17, %s1474_s9 }
 0xfdf   :  { %v874_v18 = vpop.permute.xlu0 %873 }
 0xfe0   :  { %v1687_v19 = vmul.f32 %v1362_v7, %v874_v18 }
 0xfe2   :  { %891 = vrot.lane.b32.xlu1 %v1687_v19, %s1475_s4 }
0x1054   :  { %v892_v20 = vpop.permute.xlu1 %891 }
0x1055   :  { %1291 = vmatmul.mubr.msk.f32.vlgmr.msra.gmra.mxu0 %vm214_vm2, %v892_v20 }
0x1115   :  { %v961_v23 = vpop.f32.mrf.mxu0 }
0x1116   :  { %v965_v24 = vadd.f32 %v961_v23, %v201_v22 }
0x1117   :  { %v1292_v25 = vpop.f32.mrf.mxu0 }
0x1118   :  { %1365 = vtanh.f32 %v965_v24  ;;  %v966_v27 = vsub.f32 0.0, %v965_v24 }
0x111a   :  { %v967_v28 = vmul.f32 1.442695, %v966_v27 }
0x111c   :  { %1367 = vpow2.f32 %v967_v28 }
0x1125   :  { %v1366_v26 = vpop.eup %1365 }
0x1126   :  { %975 = vrot.lane.b32.xlu0 %v1366_v26, %s1474_s9 }
0x1129   :  { %v1368_v30 = vpop.eup %1367 }
0x112a   :  { %v969_v31 = vadd.f32 1.0, %v1368_v30 }
0x112c   :  { %1369 = vrcp.f32 %v969_v31 }
0x1139   :  { %v1370_v32 = vpop.eup %1369 }
0x113a   :  { %v973_v35 = vmul.f32 %v1370_v32, %v870_v16 }
0x1198   :  { %v976_v33 = vpop.permute.xlu0 %975 }
0x1199   :  { %v978_v34 = vmul.f32 %v1370_v32, %v976_v33 }
0x119b   :  { %980 = vrot.lane.b32.xlu1 %v978_v34, %s1475_s4 }
0x120d   :  { %v981_v61 = vpop.permute.xlu1 %980 }
0x120e   :  { %v983_v36 = vadd.f32 %v981_v61, %v973_v35 }
0x1210   :  { %1371 = vtanh.f32 %v983_v36 }
0x121d   :  { %v1372_v37 = vpop.eup %1371 }
0x121e   :  { %986 = vrot.lane.b32.xlu0 %v1372_v37, %s1474_s9 }
0x1290   :  { %v987_v38 = vpop.permute.xlu0 %986 }
0x1291   :  { %v1697_v39 = vmul.f32 %v1370_v32, %v987_v38 }
0x1293   :  { %1004 = vrot.lane.b32.xlu1 %v1697_v39, %s1475_s4 }
0x1305   :  { %v1005_v40 = vpop.permute.xlu1 %1004 }
0x1306   :  { %1302 = vmatmul.mubr.msk.f32.vlgmr.msra.gmra.mxu1 %vm214_vm2, %v1005_v40 }
0x13c6   :  { %v1074_v44 = vpop.f32.mrf.mxu1 }
0x13c7   :  { %v1078_v45 = vadd.f32 %v1074_v44, %v206_v43 }
0x13c8   :  { %v1303_v46 = vpop.f32.mrf.mxu1 }
0x13c9   :  { %1373 = vtanh.f32 %v1078_v45  ;;  %v1079_v60 = vsub.f32 0.0, %v1078_v45 }
0x13cb   :  { %v1080_v52 = vmul.f32 1.442695, %v1079_v60 }
0x13cd   :  { %1375 = vpow2.f32 %v1080_v52 }
0x13d6   :  { %v1374_v48 = vpop.eup %1373 }
0x13d7   :  { %1088 = vrot.lane.b32.xlu0 %v1374_v48, %s1474_s9 }
0x13da   :  { %v1376_v53 = vpop.eup %1375 }
0x13db   :  { %316 = vperm.xlu0 %1315, %v314_v49   ;;  %v1082_v55 = vadd.f32 1.0, %v1376_v53 }
0x13dd   :  { %1377 = vrcp.f32 %v1082_v55 }
0x13df   :  { %654 = vperm.xlu0 %1315, %v652_v50  }
0x13e3   :  { %880 = vperm.xlu0 %1315, %v878_v51  }
0x13e7   :  { %1106 = vperm.xlu0 %1315, %v1104_v10  }
0x13ea   :  { %v1378_v56 = vpop.eup %1377 }
0x13eb   :  { %v1086_v11 = vmul.f32 %v1378_v56, %v983_v36 }
0x1449   :  { %v1089_v57 = vpop.permute.xlu0 %1088 }
0x144a   :  { %v1091_v59 = vmul.f32 %v1378_v56, %v1089_v57 }
0x144c   :  { %1093 = vrot.lane.b32.xlu1 %v1091_v59, %s1475_s4 }
0x1450   :  { %428 = vperm.xlu1 %1316, %v426_v62  }
0x1454   :  { %541 = vperm.xlu1 %1316, %v539_v63  }
0x1456   :  { %v317_v5 = vpop.permute.xlu0 %316 }
0x1457   :  { %vm318_vm11 = vcmp.eq.s32.totalorder %v317_v5, 1 }
0x1458   :  { %v319_v6 = vsel %vm318_vm11, %v1576_v29, 0.0  ;;  %767 = vperm.xlu1 %1316, %v765_v3  }
0x1459   :  { %321 = vrot.lane.b32.xlu0 %v319_v6, %s1475_s4 }
0x145a   :  { %v655_v9 = vpop.permute.xlu0 %654 }
0x145b   :  { %vm656_vm14 = vcmp.eq.s32.totalorder %v655_v9, 1 }
0x145c   :  { %993 = vperm.xlu1 %1316, %v991_v2   ;;  %v657_v18 = vsel %vm656_vm14, %v1649_v41, 0.0 }
0x145e   :  { %v881_v13 = vpop.permute.xlu0 %880 }
0x145f   :  { %vm882_vm0 = vcmp.eq.s32.totalorder %v881_v13, 1 }
0x1462   :  { %v1107_v14 = vpop.permute.xlu0 %1106 }
0x1463   :  { %vm1108_vm3 = vcmp.eq.s32.totalorder %v1107_v14, 1 }
0x14be   :  { %v1094_v12 = vpop.permute.xlu1 %1093 }
0x14bf   :  { %v1096_v4 = vadd.f32 %v1094_v12, %v1086_v11 }
0x14c1   :  { %1379 = vtanh.f32 %v1096_v4 }
0x14cb   :  { %v322_v7 = vpop.permute.xlu0 %321  ;;  %v429_v0 = vpop.permute.xlu1 %428 }
0x14cc   :  { %324 = vst.msk [vmem:[#allocation8] sm:$0xff] %vm214_vm2, %v322_v7  ;;  %vm430_vm12 = vcmp.eq.s32.totalorder %v429_v0, 1 }
0x14cd   :  { %v431_v58 = vsel %vm430_vm12, %v1603_v54, 0.0 }
0x14ce   :  { %v1380_v15 = vpop.eup %1379 }
0x14cf   :  { %v542_v8 = vpop.permute.xlu1 %541  ;;  %1099 = vrot.lane.b32.xlu1 %v1380_v15, %s1474_s9 }
0x14d0   :  { %vm543_vm13 = vcmp.eq.s32.totalorder %v542_v8, 1 }
0x14d1   :  { %v544_v29 = vsel %vm543_vm13, %v1630_v21, 0.0  ;;  %v883_v21 = vsel %vm882_vm0, %v1687_v19, 0.0 }
0x14d2   :  { %546 = vrot.lane.b32.xlu0 %v544_v29, %s1475_s4 }
0x14d3   :  { %v768_v16 = vpop.permute.xlu1 %767  ;;  %433 = vrot.lane.b32.xlu1 %v431_v58, %s1475_s4 }
0x14d4   :  { %vm769_vm15 = vcmp.eq.s32.totalorder %v768_v16, 1 }
0x14d5   :  { %v770_v17 = vsel %vm769_vm15, %v1668_v1, 0.0 }
0x14d6   :  { %772 = vrot.lane.b32.xlu0 %v770_v17, %s1475_s4 }
0x14d7   :  { %v994_v20 = vpop.permute.xlu1 %993  ;;  %659 = vrot.lane.b32.xlu1 %v657_v18, %s1475_s4 }
0x14d8   :  { %vm995_vm1 = vcmp.eq.s32.totalorder %v994_v20, 1 }
0x14d9   :  { %v996_v54 = vsel %vm995_vm1, %v1697_v39, 0.0 }
0x14da   :  { %998 = vrot.lane.b32.xlu0 %v996_v54, %s1475_s4 }
0x14db   :  { %885 = vrot.lane.b32.xlu1 %v883_v21, %s1475_s4 }
0x1541   :  { %v1100_v22 = vpop.permute.xlu1 %1099 }
0x1542   :  { %v1102_v23 = vmul.f32 %v1378_v56, %v1100_v22 }
0x1544   :  { %v547_v1 = vpop.permute.xlu0 %546  ;;  %v1109_v41 = vsel %vm1108_vm3, %v1102_v23, 0.0 }
0x1545   :  { %550 = vst.msk [vmem:[#allocation8 + $0x10] sm:$0xff] %vm214_vm2, %v547_v1  ;;  %1111 = vrot.lane.b32.xlu1 %v1109_v41, %s1475_s4  ;;  %v434_v24 = vpop.permute.xlu1 %433 }
0x1546   :  { %437 = vst.msk [vmem:[#allocation8 + $0x8] sm:$0xff] %vm214_vm2, %v434_v24 }
0x1548   :  { %v773_v25 = vpop.permute.xlu0 %772 }
0x1549   :  { %776 = vst.msk [vmem:[#allocation8 + $0x20] sm:$0xff] %vm214_vm2, %v773_v25  ;;  %v660_v19 = vpop.permute.xlu1 %659 }
0x154a   :  { %663 = vst.msk [vmem:[#allocation8 + $0x18] sm:$0xff] %vm214_vm2, %v660_v19 }
0x154c   :  { %v999_v26 = vpop.permute.xlu0 %998 }
0x154d   :  { %1002 = vst.msk [vmem:[#allocation8 + $0x30] sm:$0xff] %vm214_vm2, %v999_v26  ;;  %v886_v27 = vpop.permute.xlu1 %885 }
0x154e   :  { %889 = vst.msk [vmem:[#allocation8 + $0x28] sm:$0xff] %vm214_vm2, %v886_v27 }
0x15b7   :  { %v1112_v28 = vpop.permute.xlu1 %1111 }
0x15b8   :  { %1115 = vst.msk [vmem:[#allocation8 + $0x38] sm:$0xff] %vm214_vm2, %v1112_v28 }
0x15b9   :  { %1452 = shalt.err (!%p1449_p5)
}
0x15ba   :  { %1127 = dma.vmem_to_hbm [thread:$0]  %s1122_s12, 1024, %s1744_s5, [#allocation4], %s1469_s23, %s1469_s23, %s1470_s24  }
0x15bb   :  { %1465 = dma.done.wait [#allocation4], 1024  }
0x15bc   :  { %1466 = vsyncadd [#allocation4], 4294966272 }
0x15bd   :  { %1131 = vsyncpa [#allocation3], 1 }
0x15be   :  { %1132 = vsyncpa [#allocation6], 1 }
0x15bf   :  { %1133 = vsyncpa [#allocation4], 1 }

</bundles_post_ra>
